<compile_context>
chip_gen: v7x
topology: tpu7x:2x2x1
jax: 0.10.0
libtpu: 0.0.40
codegen_flags: <defaults>
</compile_context>

<pallas_src>
import functools

import jax
import jax.numpy as jnp
from jax import lax
from jax.experimental import pallas as pl
from jax.experimental.pallas import tpu as pltpu


# ----------------------------------------------------------------------------
# Pallas kernel: TB batch elements per grid step, all four branches fused.
# ----------------------------------------------------------------------------
def mtc_kernel(x_ref,
               wf_ref, bf_ref,          # fused 1x1 weights/bias (branches 1/2a/3a)
               w2b_ref, b2b_ref,        # k=3 conv, reshaped to (3*c20, c21)
               w3b_ref, b3b_ref,        # k=5 conv, reshaped to (5*c30, c31)
               w4_ref, b4_ref,          # branch-4 1x1 conv
               out_ref,
               *, c1, c20, c30):
    f32 = jnp.float32
    x = x_ref[...]                                 # (TB, L, Cin), compute dtype
    TB, L, Cin = x.shape
    cdt = x.dtype
    xm = x.reshape(TB * L, Cin)

    # ---- fused 1x1 convs (+folded BN) + ReLU: one MXU push for 3 branches ----
    h = jnp.dot(xm, wf_ref[...], preferred_element_type=f32) + bf_ref[...]
    h = jnp.maximum(h, 0.0)                        # (TB*L, c1 + c20 + c30) f32

    y1 = h[:, 0:c1]                                # branch 1 output (f32)
    h2 = h[:, c1:c1 + c20].reshape(TB, L, c20).astype(cdt)
    h3 = h[:, c1 + c20:c1 + c20 + c30].reshape(TB, L, c30).astype(cdt)

    # ---- branch 2: k=3 conv (pad=1) as ONE matmul over 3 shifted copies -----
    z2 = jnp.zeros((TB, 1, c20), cdt)
    taps2 = jnp.concatenate(
        [jnp.concatenate([z2, h2[:, :L - 1, :]], axis=1),   # h2[l-1]
         h2,                                                # h2[l]
         jnp.concatenate([h2[:, 1:, :], z2], axis=1)],      # h2[l+1]
        axis=-1).reshape(TB * L, 3 * c20)
    y2 = jnp.maximum(
        jnp.dot(taps2, w2b_ref[...], preferred_element_type=f32) + b2b_ref[...],
        0.0)

    # ---- branch 3: k=5 conv (pad=2) as ONE matmul over 5 shifted copies -----
    z3 = jnp.zeros((TB, 2, c30), cdt)
    h3m2 = jnp.concatenate([z3, h3[:, :L - 2, :]], axis=1)          # h3[l-2]
    h3m1 = jnp.concatenate([z3[:, :1, :], h3[:, :L - 1, :]], axis=1)  # h3[l-1]
    h3p1 = jnp.concatenate([h3[:, 1:, :], z3[:, :1, :]], axis=1)      # h3[l+1]
    h3p2 = jnp.concatenate([h3[:, 2:, :], z3], axis=1)                # h3[l+2]
    taps3 = jnp.concatenate([h3m2, h3m1, h3, h3p1, h3p2],
                            axis=-1).reshape(TB * L, 5 * c30)
    y3 = jnp.maximum(
        jnp.dot(taps3, w3b_ref[...], preferred_element_type=f32) + b3b_ref[...],
        0.0)

    # ---- branch 4: maxpool(k=3, stride=1, pad=1) -> 1x1 conv + ReLU ---------
    neg = jnp.full((TB, 1, Cin), -jnp.inf, cdt)
    xl = jnp.concatenate([neg, x[:, :L - 1, :]], axis=1)
    xr = jnp.concatenate([x[:, 1:, :], neg], axis=1)
    xp = jnp.maximum(jnp.maximum(xl, x), xr).reshape(TB * L, Cin)
    y4 = jnp.maximum(
        jnp.dot(xp, w4_ref[...], preferred_element_type=f32) + b4_ref[...], 0.0)

    # ---- single lane-dense output store (concat along channel/lane axis) ----
    out = jnp.concatenate([y1, y2, y3, y4], axis=-1)        # (TB*L, ctot) f32
    out_ref[...] = out.reshape(out_ref.shape).astype(out_ref.dtype)


# ----------------------------------------------------------------------------
# Wrapper
# ----------------------------------------------------------------------------
def mtc_forward(x_ncl, params, *, compute_dtype=jnp.float32, rows_target=256):
    """x_ncl: (N, C_in, L) float32, like the PyTorch module. Returns (N, C_out, L).

    compute_dtype: dtype of the matmul *inputs* (accumulation stays f32).
    Use jnp.bfloat16 on v6e/v7x for the fast MXU path; f32 is bit-faithful.
    """
    N, Cin, L = x_ncl.shape
    (w1, b1, w2a, b2a, w2b, b2b, w3a, b3a, w3b, b3b, w4, b4) = params
    c1 = w1.shape[1]
    c20, c21 = w2a.shape[1], w2b.shape[2]
    c30, c31 = w3a.shape[1], w3b.shape[2]
    c4 = w4.shape[1]
    ctot = c1 + c21 + c31 + c4

    # NCL -> NLC once (channels on lanes).
    x = jnp.transpose(x_ncl, (0, 2, 1)).astype(compute_dtype)       # (N, L, Cin)

    # Fuse the three shared-input 1x1 convs into a single weight / bias.
    wf = jnp.concatenate([w1, w2a, w3a], axis=1).astype(compute_dtype)
    bf = jnp.concatenate([b1, b2a, b3a], axis=1).astype(jnp.float32)
    w2b_r = w2b.reshape(3 * c20, c21).astype(compute_dtype)
    w3b_r = w3b.reshape(5 * c30, c31).astype(compute_dtype)
    w4_c = w4.astype(compute_dtype)
    b2b_f = b2b.astype(jnp.float32)
    b3b_f = b3b.astype(jnp.float32)
    b4_f = b4.astype(jnp.float32)

    # Batch several examples per grid step so the matmul M dim is TB*L rows.
    TB = max(1, min(N, rows_target // max(L, 1)))
    G = -(-N // TB)
    Npad = G * TB
    if Npad != N:
        x = jnp.concatenate(
            [x, jnp.zeros((Npad - N, L, Cin), x.dtype)], axis=0)

    def full_spec(a):
        nd = a.ndim
        return pl.BlockSpec(a.shape, lambda b, _nd=nd: (0,) * _nd)

    weights = (wf, bf, w2b_r, b2b_f, w3b_r, b3b_f, w4_c, b4_f)
    in_specs = [pl.BlockSpec((TB, L, Cin), lambda b: (b, 0, 0))]
    in_specs += [full_spec(p) for p in weights]

    kernel = functools.partial(mtc_kernel, c1=c1, c20=c20, c30=c30)

    # TODO(synk): for production-scale L, tile the grid over L with a 2-row
    # halo (k=5) and set vmem_limit_bytes explicitly (v7x has 64 MiB VMEM).
    out = pl.pallas_call(
        kernel,
        out_shape=jax.ShapeDtypeStruct((Npad, L, ctot), jnp.float32),
        grid_spec=pltpu.PrefetchScalarGridSpec(
            num_scalar_prefetch=0,
            grid=(G,),
            in_specs=in_specs,
            out_specs=pl.BlockSpec((TB, L, ctot), lambda b: (b, 0, 0))),
        compiler_params=pltpu.CompilerParams(
            dimension_semantics=("parallel",)),
    )(x, *weights)

    return jnp.transpose(out[:N], (0, 2, 1))                        # (N, C_out, L)


# ----------------------------------------------------------------------------
# Deterministic parameter construction (Conv + BatchNorm folded, eval mode).
# ----------------------------------------------------------------------------
def _fold_bn(key, cin, cout, ksize, eps=1e-5):
    """Conv weight/bias with eval-mode BN folded in.
    Returns weight (K, Cin, Cout) (or (Cin, Cout) if K==1) and bias (1, Cout)."""
    kw, kb, kg, kbe, km, kv = jax.random.split(key, 6)
    w = jax.random.normal(kw, (ksize, cin, cout), jnp.float32) * 0.2
    b = jax.random.normal(kb, (cout,), jnp.float32) * 0.1
    gamma = 1.0 + 0.1 * jax.random.normal(kg, (cout,), jnp.float32)
    beta = 0.1 * jax.random.normal(kbe, (cout,), jnp.float32)
    mean = 0.1 * jax.random.normal(km, (cout,), jnp.float32)
    var = 0.5 + jax.random.uniform(kv, (cout,), jnp.float32)
    scale = gamma / jnp.sqrt(var + eps)
    w_eff = w * scale[None, None, :]
    b_eff = (b - mean) * scale + beta
    if ksize == 1:
        w_eff = w_eff[0]
    return w_eff, b_eff.reshape(1, cout)


def make_params(key, input_channels, c1, c2, c3, c4):
    ks = jax.random.split(key, 6)
    w1, b1 = _fold_bn(ks[0], input_channels, c1, 1)
    w2a, b2a = _fold_bn(ks[1], input_channels, c2[0], 1)
    w2b, b2b = _fold_bn(ks[2], c2[0], c2[1], 3)
    w3a, b3a = _fold_bn(ks[3], input_channels, c3[0], 1)
    w3b, b3b = _fold_bn(ks[4], c3[0], c3[1], 5)
    w4, b4 = _fold_bn(ks[5], input_channels, c4, 1)
    return (w1, b1, w2a, b2a, w2b, b2b, w3a, b3a, w3b, b3b, w4, b4)


# ----------------------------------------------------------------------------
# Pure-JAX reference (XLA convs) for validation.
# ----------------------------------------------------------------------------
def _conv1d_ref(x_ncl, w, b, pad):
    if w.ndim == 2:
        w_oiw = jnp.transpose(w, (1, 0))[:, :, None]
    else:
        w_oiw = jnp.transpose(w, (2, 1, 0))
    y = lax.conv_general_dilated(
        x_ncl, w_oiw, window_strides=(1,), padding=[(pad, pad)],
        dimension_numbers=('NCH', 'OIH', 'NCH'))
    return jnp.maximum(y + b.reshape(1, -1, 1), 0.0)


def mtc_reference(x_ncl, params):
    (w1, b1, w2a, b2a, w2b, b2b, w3a, b3a, w3b, b3b, w4, b4) = params
    y1 = _conv1d_ref(x_ncl, w1, b1, 0)
    y2 = _conv1d_ref(_conv1d_ref(x_ncl, w2a, b2a, 0), w2b, b2b, 1)
    y3 = _conv1d_ref(_conv1d_ref(x_ncl, w3a, b3a, 0), w3b, b3b, 2)
    xp = lax.reduce_window(x_ncl, -jnp.inf, lax.max,
                           (1, 1, 3), (1, 1, 1), [(0, 0), (0, 0), (1, 1)])
    y4 = _conv1d_ref(xp, w4, b4, 0)
    return jnp.concatenate([y1, y2, y3, y4], axis=1)


# ----------------------------------------------------------------------------
if __name__ == "__main__":
    key = jax.random.PRNGKey(0)
    kx, kp = jax.random.split(key)

    N, Cin, L = 2, 8, 16
    c1, c2, c3, c4 = 8, (8, 16), (8, 8), 8

    x = jax.random.normal(kx, (N, Cin, L), jnp.float32)
    params = make_params(kp, Cin, c1, c2, c3, c4)

    ref = mtc_reference(x, params)

    # f32 matmul inputs: bit-faithful to the reference.
    out = jax.block_until_ready(mtc_forward(x, params))
    assert out.shape == ref.shape == (N, c1 + c2[1] + c3[1] + c4, L)
    assert jnp.allclose(out, ref, atol=1e-4, rtol=1e-4), (
        f"max abs diff {jnp.max(jnp.abs(out - ref))}")

    # bf16 matmul inputs (v6e/v7x MXU fast path), f32 accumulation.
    out_bf16 = jax.block_until_ready(
        mtc_forward(x, params, compute_dtype=jnp.bfloat16))
    assert jnp.allclose(out_bf16, ref, atol=5e-2, rtol=5e-2), (
        f"bf16 max abs diff {jnp.max(jnp.abs(out_bf16 - ref))}")

    print("KERNEL_OK")
</pallas_src>

<mosaic_0001>
module attributes {stable_mosaic.version = 11 : i64} {
  func.func @mtc_kernel(%arg0: i32, %arg1: memref<2x16x8xf32, #tpu.memory_space<vmem>>, %arg2: memref<8x24xf32, #tpu.memory_space<vmem>>, %arg3: memref<1x24xf32, #tpu.memory_space<vmem>>, %arg4: memref<24x16xf32, #tpu.memory_space<vmem>>, %arg5: memref<1x16xf32, #tpu.memory_space<vmem>>, %arg6: memref<40x8xf32, #tpu.memory_space<vmem>>, %arg7: memref<1x8xf32, #tpu.memory_space<vmem>>, %arg8: memref<8x8xf32, #tpu.memory_space<vmem>>, %arg9: memref<1x8xf32, #tpu.memory_space<vmem>>, %arg10: memref<2x16x40xf32, #tpu.memory_space<vmem>>) attributes {dimension_semantics = [#tpu.dimension_semantics<parallel>], iteration_bounds = array<i64: 1>, scalar_prefetch = 0 : i64, scratch_operands = 0 : i64, tpu.core_type = #tpu.core_type<tc>, window_params = [{transform_indices = @transform_0, window_bounds = array<i64: 2, 16, 8>}, {pipeline_mode = #tpu.pipeline_mode<synchronous>, transform_indices = @transform_1, window_bounds = array<i64: 8, 24>}, {pipeline_mode = #tpu.pipeline_mode<synchronous>, transform_indices = @transform_2, window_bounds = array<i64: 1, 24>}, {pipeline_mode = #tpu.pipeline_mode<synchronous>, transform_indices = @transform_3, window_bounds = array<i64: 24, 16>}, {pipeline_mode = #tpu.pipeline_mode<synchronous>, transform_indices = @transform_4, window_bounds = array<i64: 1, 16>}, {pipeline_mode = #tpu.pipeline_mode<synchronous>, transform_indices = @transform_5, window_bounds = array<i64: 40, 8>}, {pipeline_mode = #tpu.pipeline_mode<synchronous>, transform_indices = @transform_6, window_bounds = array<i64: 1, 8>}, {pipeline_mode = #tpu.pipeline_mode<synchronous>, transform_indices = @transform_7, window_bounds = array<i64: 8, 8>}, {pipeline_mode = #tpu.pipeline_mode<synchronous>, transform_indices = @transform_8, window_bounds = array<i64: 1, 8>}, {transform_indices = @transform_9, window_bounds = array<i64: 2, 16, 40>}]} {
    %c0 = arith.constant 0 : index
    %c0_0 = arith.constant 0 : index
    %c0_1 = arith.constant 0 : index
    %0 = vector.load %arg1[%c0, %c0_0, %c0_1] : memref<2x16x8xf32, #tpu.memory_space<vmem>>, vector<2x16x8xf32>
    %1 = vector.shape_cast %0 : vector<2x16x8xf32> to vector<32x8xf32>
    %c0_2 = arith.constant 0 : index
    %c0_3 = arith.constant 0 : index
    %2 = vector.load %arg2[%c0_2, %c0_3] : memref<8x24xf32, #tpu.memory_space<vmem>>, vector<8x24xf32>
    %cst = arith.constant dense<0.000000e+00> : vector<32x24xf32>
    %3 = tpu.matmul %1, %2, %cst {dimension_numbers = #tpu.dot_dimension_numbers<[1], [0], [0], [1], [0, 0, 1, 1], [], []>} : vector<32x8xf32>, vector<8x24xf32>, vector<32x24xf32> -> vector<32x24xf32>
    %c0_4 = arith.constant 0 : index
    %c0_5 = arith.constant 0 : index
    %4 = vector.load %arg3[%c0_4, %c0_5] : memref<1x24xf32, #tpu.memory_space<vmem>>, vector<1x24xf32>
    %5 = vector.broadcast %4 : vector<1x24xf32> to vector<32x24xf32>
    %6 = arith.addf %3, %5 : vector<32x24xf32>
    %cst_6 = arith.constant 0.000000e+00 : f32
    %7 = vector.broadcast %cst_6 : f32 to vector<32x24xf32>
    %8 = arith.maximumf %6, %7 : vector<32x24xf32>
    %9 = vector.extract_strided_slice %8 {offsets = [0, 0], sizes = [32, 8], strides = [1, 1]} : vector<32x24xf32> to vector<32x8xf32>
    %10 = vector.extract_strided_slice %8 {offsets = [0, 8], sizes = [32, 8], strides = [1, 1]} : vector<32x24xf32> to vector<32x8xf32>
    %11 = vector.shape_cast %10 : vector<32x8xf32> to vector<2x16x8xf32>
    %12 = vector.extract_strided_slice %8 {offsets = [0, 16], sizes = [32, 8], strides = [1, 1]} : vector<32x24xf32> to vector<32x8xf32>
    %13 = vector.shape_cast %12 : vector<32x8xf32> to vector<2x16x8xf32>
    %cst_7 = arith.constant 0.000000e+00 : f32
    %14 = vector.broadcast %cst_7 : f32 to vector<2x1x8xf32>
    %15 = vector.extract_strided_slice %11 {offsets = [0, 0, 0], sizes = [2, 15, 8], strides = [1, 1, 1]} : vector<2x16x8xf32> to vector<2x15x8xf32>
    %16 = tpu.concatenate %14, %15 in 1 : vector<2x1x8xf32>, vector<2x15x8xf32> -> vector<2x16x8xf32>
    %17 = vector.extract_strided_slice %11 {offsets = [0, 1, 0], sizes = [2, 15, 8], strides = [1, 1, 1]} : vector<2x16x8xf32> to vector<2x15x8xf32>
    %18 = tpu.concatenate %17, %14 in 1 : vector<2x15x8xf32>, vector<2x1x8xf32> -> vector<2x16x8xf32>
    %19 = tpu.concatenate %16, %11, %18 in 2 : vector<2x16x8xf32>, vector<2x16x8xf32>, vector<2x16x8xf32> -> vector<2x16x24xf32>
    %20 = vector.shape_cast %19 : vector<2x16x24xf32> to vector<32x24xf32>
    %c0_8 = arith.constant 0 : index
    %c0_9 = arith.constant 0 : index
    %21 = vector.load %arg4[%c0_8, %c0_9] : memref<24x16xf32, #tpu.memory_space<vmem>>, vector<24x16xf32>
    %cst_10 = arith.constant dense<0.000000e+00> : vector<32x16xf32>
    %22 = tpu.matmul %20, %21, %cst_10 {dimension_numbers = #tpu.dot_dimension_numbers<[1], [0], [0], [1], [0, 0, 1, 1], [], []>} : vector<32x24xf32>, vector<24x16xf32>, vector<32x16xf32> -> vector<32x16xf32>
    %c0_11 = arith.constant 0 : index
    %c0_12 = arith.constant 0 : index
    %23 = vector.load %arg5[%c0_11, %c0_12] : memref<1x16xf32, #tpu.memory_space<vmem>>, vector<1x16xf32>
    %24 = vector.broadcast %23 : vector<1x16xf32> to vector<32x16xf32>
    %25 = arith.addf %22, %24 : vector<32x16xf32>
    %cst_13 = arith.constant 0.000000e+00 : f32
    %26 = vector.broadcast %cst_13 : f32 to vector<32x16xf32>
    %27 = arith.maximumf %25, %26 : vector<32x16xf32>
    %cst_14 = arith.constant 0.000000e+00 : f32
    %28 = vector.broadcast %cst_14 : f32 to vector<2x2x8xf32>
    %29 = vector.extract_strided_slice %13 {offsets = [0, 0, 0], sizes = [2, 14, 8], strides = [1, 1, 1]} : vector<2x16x8xf32> to vector<2x14x8xf32>
    %30 = tpu.concatenate %28, %29 in 1 : vector<2x2x8xf32>, vector<2x14x8xf32> -> vector<2x16x8xf32>
    %31 = vector.extract_strided_slice %28 {offsets = [0, 0, 0], sizes = [2, 1, 8], strides = [1, 1, 1]} : vector<2x2x8xf32> to vector<2x1x8xf32>
    %32 = vector.extract_strided_slice %13 {offsets = [0, 0, 0], sizes = [2, 15, 8], strides = [1, 1, 1]} : vector<2x16x8xf32> to vector<2x15x8xf32>
    %33 = tpu.concatenate %31, %32 in 1 : vector<2x1x8xf32>, vector<2x15x8xf32> -> vector<2x16x8xf32>
    %34 = vector.extract_strided_slice %13 {offsets = [0, 1, 0], sizes = [2, 15, 8], strides = [1, 1, 1]} : vector<2x16x8xf32> to vector<2x15x8xf32>
    %35 = vector.extract_strided_slice %28 {offsets = [0, 0, 0], sizes = [2, 1, 8], strides = [1, 1, 1]} : vector<2x2x8xf32> to vector<2x1x8xf32>
    %36 = tpu.concatenate %34, %35 in 1 : vector<2x15x8xf32>, vector<2x1x8xf32> -> vector<2x16x8xf32>
    %37 = vector.extract_strided_slice %13 {offsets = [0, 2, 0], sizes = [2, 14, 8], strides = [1, 1, 1]} : vector<2x16x8xf32> to vector<2x14x8xf32>
    %38 = tpu.concatenate %37, %28 in 1 : vector<2x14x8xf32>, vector<2x2x8xf32> -> vector<2x16x8xf32>
    %39 = tpu.concatenate %30, %33, %13, %36, %38 in 2 : vector<2x16x8xf32>, vector<2x16x8xf32>, vector<2x16x8xf32>, vector<2x16x8xf32>, vector<2x16x8xf32> -> vector<2x16x40xf32>
    %40 = vector.shape_cast %39 : vector<2x16x40xf32> to vector<32x40xf32>
    %c0_15 = arith.constant 0 : index
    %c0_16 = arith.constant 0 : index
    %41 = vector.load %arg6[%c0_15, %c0_16] : memref<40x8xf32, #tpu.memory_space<vmem>>, vector<40x8xf32>
    %cst_17 = arith.constant dense<0.000000e+00> : vector<32x8xf32>
    %42 = tpu.matmul %40, %41, %cst_17 {dimension_numbers = #tpu.dot_dimension_numbers<[1], [0], [0], [1], [0, 0, 1, 1], [], []>} : vector<32x40xf32>, vector<40x8xf32>, vector<32x8xf32> -> vector<32x8xf32>
    %c0_18 = arith.constant 0 : index
    %c0_19 = arith.constant 0 : index
    %43 = vector.load %arg7[%c0_18, %c0_19] : memref<1x8xf32, #tpu.memory_space<vmem>>, vector<1x8xf32>
    %44 = vector.broadcast %43 : vector<1x8xf32> to vector<32x8xf32>
    %45 = arith.addf %42, %44 : vector<32x8xf32>
    %cst_20 = arith.constant 0.000000e+00 : f32
    %46 = vector.broadcast %cst_20 : f32 to vector<32x8xf32>
    %47 = arith.maximumf %45, %46 : vector<32x8xf32>
    %cst_21 = arith.constant 0xFF800000 : f32
    %48 = vector.broadcast %cst_21 : f32 to vector<2x1x8xf32>
    %49 = vector.extract_strided_slice %0 {offsets = [0, 0, 0], sizes = [2, 15, 8], strides = [1, 1, 1]} : vector<2x16x8xf32> to vector<2x15x8xf32>
    %50 = tpu.concatenate %48, %49 in 1 : vector<2x1x8xf32>, vector<2x15x8xf32> -> vector<2x16x8xf32>
    %51 = vector.extract_strided_slice %0 {offsets = [0, 1, 0], sizes = [2, 15, 8], strides = [1, 1, 1]} : vector<2x16x8xf32> to vector<2x15x8xf32>
    %52 = tpu.concatenate %51, %48 in 1 : vector<2x15x8xf32>, vector<2x1x8xf32> -> vector<2x16x8xf32>
    %53 = arith.maximumf %50, %0 : vector<2x16x8xf32>
    %54 = arith.maximumf %53, %52 : vector<2x16x8xf32>
    %55 = vector.shape_cast %54 : vector<2x16x8xf32> to vector<32x8xf32>
    %c0_22 = arith.constant 0 : index
    %c0_23 = arith.constant 0 : index
    %56 = vector.load %arg8[%c0_22, %c0_23] : memref<8x8xf32, #tpu.memory_space<vmem>>, vector<8x8xf32>
    %cst_24 = arith.constant dense<0.000000e+00> : vector<32x8xf32>
    %57 = tpu.matmul %55, %56, %cst_24 {dimension_numbers = #tpu.dot_dimension_numbers<[1], [0], [0], [1], [0, 0, 1, 1], [], []>} : vector<32x8xf32>, vector<8x8xf32>, vector<32x8xf32> -> vector<32x8xf32>
    %c0_25 = arith.constant 0 : index
    %c0_26 = arith.constant 0 : index
    %58 = vector.load %arg9[%c0_25, %c0_26] : memref<1x8xf32, #tpu.memory_space<vmem>>, vector<1x8xf32>
    %59 = vector.broadcast %58 : vector<1x8xf32> to vector<32x8xf32>
    %60 = arith.addf %57, %59 : vector<32x8xf32>
    %cst_27 = arith.constant 0.000000e+00 : f32
    %61 = vector.broadcast %cst_27 : f32 to vector<32x8xf32>
    %62 = arith.maximumf %60, %61 : vector<32x8xf32>
    %63 = tpu.concatenate %9, %27, %47, %62 in 1 : vector<32x8xf32>, vector<32x16xf32>, vector<32x8xf32>, vector<32x8xf32> -> vector<32x40xf32>
    %64 = vector.shape_cast %63 : vector<32x40xf32> to vector<2x16x40xf32>
    %c0_28 = arith.constant 0 : index
    %c0_29 = arith.constant 0 : index
    %c0_30 = arith.constant 0 : index
    %65 = vector.load %arg10[%c0_28, %c0_29, %c0_30] : memref<2x16x40xf32, #tpu.memory_space<vmem>>, vector<2x16x40xf32>
    tpu.vector_store %arg10[%c0_28, %c0_29, %c0_30], %64 {strides = array<i32>} : memref<2x16x40xf32, #tpu.memory_space<vmem>>, vector<2x16x40xf32>,
    return
  }
  func.func @transform_0(%arg0: i32) -> (i32, i32, i32) {
    %c0_i32 = arith.constant 0 : i32
    %c0_i32_0 = arith.constant 0 : i32
    %c0_i32_1 = arith.constant 0 : i32
    return %arg0, %c0_i32, %c0_i32_0 : i32, i32, i32
  }
  func.func @transform_1(%arg0: i32) -> (i32, i32) {
    %c0_i32 = arith.constant 0 : i32
    %c0_i32_0 = arith.constant 0 : i32
    %c0_i32_1 = arith.constant 0 : i32
    return %c0_i32, %c0_i32_0 : i32, i32
  }
  func.func @transform_2(%arg0: i32) -> (i32, i32) {
    %c0_i32 = arith.constant 0 : i32
    %c0_i32_0 = arith.constant 0 : i32
    %c0_i32_1 = arith.constant 0 : i32
    return %c0_i32, %c0_i32_0 : i32, i32
  }
  func.func @transform_3(%arg0: i32) -> (i32, i32) {
    %c0_i32 = arith.constant 0 : i32
    %c0_i32_0 = arith.constant 0 : i32
    %c0_i32_1 = arith.constant 0 : i32
    return %c0_i32, %c0_i32_0 : i32, i32
  }
  func.func @transform_4(%arg0: i32) -> (i32, i32) {
    %c0_i32 = arith.constant 0 : i32
    %c0_i32_0 = arith.constant 0 : i32
    %c0_i32_1 = arith.constant 0 : i32
    return %c0_i32, %c0_i32_0 : i32, i32
  }
  func.func @transform_5(%arg0: i32) -> (i32, i32) {
    %c0_i32 = arith.constant 0 : i32
    %c0_i32_0 = arith.constant 0 : i32
    %c0_i32_1 = arith.constant 0 : i32
    return %c0_i32, %c0_i32_0 : i32, i32
  }
  func.func @transform_6(%arg0: i32) -> (i32, i32) {
    %c0_i32 = arith.constant 0 : i32
    %c0_i32_0 = arith.constant 0 : i32
    %c0_i32_1 = arith.constant 0 : i32
    return %c0_i32, %c0_i32_0 : i32, i32
  }
  func.func @transform_7(%arg0: i32) -> (i32, i32) {
    %c0_i32 = arith.constant 0 : i32
    %c0_i32_0 = arith.constant 0 : i32
    %c0_i32_1 = arith.constant 0 : i32
    return %c0_i32, %c0_i32_0 : i32, i32
  }
  func.func @transform_8(%arg0: i32) -> (i32, i32) {
    %c0_i32 = arith.constant 0 : i32
    %c0_i32_0 = arith.constant 0 : i32
    %c0_i32_1 = arith.constant 0 : i32
    return %c0_i32, %c0_i32_0 : i32, i32
  }
  func.func @transform_9(%arg0: i32) -> (i32, i32, i32) {
    %c0_i32 = arith.constant 0 : i32
    %c0_i32_0 = arith.constant 0 : i32
    %c0_i32_1 = arith.constant 0 : i32
    return %arg0, %c0_i32, %c0_i32_0 : i32, i32, i32
  }
}

</mosaic_0001>

<bundles_post_ra>
// kernel: tpu_custom_call.1
= control target key start
LH: loop header
LB: loop body
LE: loop exit
PB: predicated region body
PF: predicated region fallthrough
CT: control target
= control target key end

     0   :  { %vm45_vm0 = vcmask 64512   ;;  %vm151_vm1 = vcmask 1040384   ;;  %vm172_vm2 = vcmask 1046528   ;;  %s1196_s0 = inlined_call_operand.vmem [shape: f32[2,16,8], index: 0, kind: input, shape index: {}]   ;;  %s1197_s1 = inlined_call_operand.vmem [shape: f32[8,24], index: 1, kind: input, shape index: {}]   ;;  %s1198_s2 = inlined_call_operand.vmem [shape: f32[1,24], index: 2, kind: input, shape index: {}]   ;;  %s1199_s3 = inlined_call_operand.vmem [shape: f32[24,16], index: 3, kind: input, shape index: {}]   ;;  %s1200_s4 = inlined_call_operand.vmem [shape: f32[1,16], index: 4, kind: input, shape index: {}]   ;;  %s1201_s5 = inlined_call_operand.vmem [shape: f32[40,8], index: 5, kind: input, shape index: {}]   ;;  %s1202_s6 = inlined_call_operand.vmem [shape: f32[1,8], index: 6, kind: input, shape index: {}]   ;;  %s1203_s7 = inlined_call_operand.vmem [shape: f32[8,8], index: 7, kind: input, shape index: {}]   ;;  %s1204_s8 = inlined_call_operand.vmem [shape: f32[1,8], index: 8, kind: input, shape index: {}]   ;;  %s1205_s9 = inlined_call_operand.hbm [shape: f32[2,16,40], index: 9, kind: output, shape index: {}]  }
   0x1   :  { %v37_v0 = vld [vmem:[%s1197_s1] sm:$0xff]  ;;  %v945_v2 = vld [vmem:[%s1196_s0 + $0x8] sm:$0xff]  ;;  %v955_v6 = vld [vmem:[%s1196_s0 + $0x10] sm:$0xff] }
   0x2   :  { %v940_v1 = vld [vmem:[%s1196_s0] sm:$0xff]  ;;  %788 = vmatprep.subr.mxu0 %v37_v0  ;;  %v522_v4 = vrot.slane %v945_v2, 7  ;;  %v534_v5 = vrot.slane %v945_v2, 1  ;;  %v960_v7 = vld [vmem:[%s1196_s0 + $0x18] sm:$0xff]  ;;  %v524_v8 = vrot.slane %v955_v6, 7 }
   0x3   :  { %790 = vmatprep.mubr.msk.f32.mxu0 %vm45_vm0, %v940_v1  ;;  %v521_v3 = vrot.slane %v940_v1, 7  ;;  %789 = vmatpush3.msra.mxu0 %v37_v0  ;;  %v525_v9 = vrot.slane %v960_v7, 7 }
   0x4   :  { %14 = vsyncpa [#allocation3], 0  ;;  %791 = vmatmul.mubr.msk.f32.vlgmr.msra.gmra.mrb[0].mxu0 %vm45_vm0, %v945_v2  ;;  %v543_v11 = vsel %vm172_vm2, %v534_v5, -inf  ;;  %v742_v16 = vld [vmem:[%s1198_s2] ss:$0 sm:$0xff]  ;;  %s876_s2 = smov 112  }
   0x5   :  { %v523_v10 = vsel %vm151_vm1, %v521_v3, %v522_v4  ;;  %793 = vmatprep.mubr.msk.f32.mxu0 %vm45_vm0, %v955_v6  ;;  %v978_v13 = vsel %vm151_vm1, %v524_v8, %v525_v9  ;;  %v206_v31 = vld [vmem:[%s1199_s3] sm:$0xff]  ;;  %v207_v32 = vld [vmem:[%s1199_s3 + $0x8] sm:$0xff]  ;;  %v208_v37 = vld [vmem:[%s1199_s3 + $0x10] sm:$0xff]  ;;  %s877_s25 = smov 120   ;;  %s878_s3 = smov 8   ;;  %vm318_vm3 = vcmask 1041408  }
   0x6   :  { %v546_v12 = vmax.f32 %v523_v10, %v945_v2  ;;  %v548_v14 = vmax.f32 %v978_v13, %v960_v7  ;;  %v832_v36 = vpack.c.bf16 %v207_v32, %v206_v31  ;;  %vm351_vm4 = vcmask 1045504   ;;  %v1040_v51 = vld [vmem:[%s1203_s7] sm:$0xff]  ;;  %v408_v53 = vld [vmem:[%s1201_s5 + $0x8] sm:$0xff]  ;;  %s879_s11 = smov 16   ;;  %v409_v0 = vld [vmem:[%s1201_s5 + $0x10] sm:$0xff] }
   0x7   :  { %v407_v52 = vld [vmem:[%s1201_s5] sm:$0xff]  ;;  %v531_v61 = vsel %vm151_vm1, -inf, %v521_v3  ;;  %v533_v62 = vrot.slane %v940_v1, 1  ;;  %v410_v4 = vld [vmem:[%s1201_s5 + $0x18] sm:$0xff]  ;;  %v532_v3 = vsel %vm151_vm1, -inf, %v524_v8  ;;  %vm201_vm5 = vcmask 130048  }
   0x8   :  { %v982_v15 = vmax.f32 %v546_v12, %v543_v11  ;;  %794 = vmatmul.mubr.msk.f32.gmra.mrb[2].mxu0 %vm45_vm0, %v960_v7  ;;  %833 = vmatprep.subr.bf16.mxu1 %v832_v36  ;;  %v836_v54 = vpack.c.bf16 %v408_v53, %v407_v52  ;;  %v545_v63 = vmax.f32 %v531_v61, %v940_v1  ;;  %v411_v1 = vld [vmem:[%s1201_s5 + $0x20] sm:$0xff]  ;;  %v536_v12 = vrot.slane %v955_v6, 1 }
   0x9   :  { %835 = vmatpush3.bf16.msra.mxu1 %v832_v36  ;;  %v840_v9 = vpack.c.bf16 %v410_v4, %v409_v0  ;;  %v535_v10 = vsel %vm172_vm2, %v533_v62, %v534_v5  ;;  %v547_v2 = vmax.f32 %v532_v3, %v955_v6  ;;  %vm216_vm6 = vcmask 195584  }
   0xa   :  { %800 = vmatprep.subr.mxu1 %v208_v37  ;;  %837 = vmatprep.subr.bf16.mxu0 %v836_v54  ;;  %v549_v11 = vmax.f32 %v545_v63, %v535_v10  ;;  %vm402_vm7 = vcmask 261120   ;;  %vm419_vm8 = vcmask 326656  }
   0xb   :  { %839 = vmatpush3.bf16.msra.mxu0 %v836_v54 }
   0xc   :  { %841 = vmatprep.subr.bf16.mxu0 %v840_v9 }
   0xd   :  { %801 = vmatpush3.msra.mxu1 %v208_v37 }
   0xe   :  { %824 = vmatprep.subr.mxu1 %v1040_v51 }
   0xf   :  { %843 = vmatpush3.bf16.msra.mxu0 %v840_v9 }
  0x10   :  { %816 = vmatprep.subr.mxu0 %v411_v1 }
  0x13   :  { %817 = vmatpush3.msra.mxu0 %v411_v1 }
  0xd7   :  { %v792_v17 = vpop.f32.mrb[0].mxu0 }
  0xd8   :  { %v130_v18 = vadd.f32 %v792_v17, %v742_v16  ;;  %v124_v19 = vpop.f32.mrb[1].mxu0 }
  0xd9   :  { %v125_v20 = vadd.f32 %v742_v16, %v124_v19 }
  0xda   :  { %v989_v21 = vmax.f32 %v130_v18, 0.0 }
  0xdb   :  { %v991_v22 = vmax.f32 %v125_v20, 0.0  ;;  %v795_v23 = vpop.f32.mrb[2].mxu0 }
  0xdc   :  { %v140_v24 = vadd.f32 %v795_v23, %v742_v16  ;;  %v134_v25 = vpop.f32.mrb[3].mxu0  ;;  %v153_v29 = vrot.slane %v989_v21, 7  ;;  %v174_v40 = vrot.slane %v989_v21, 1  ;;  %v320_v44 = vrot.slane %v989_v21, 6 }
  0xdd   :  { %v135_v26 = vadd.f32 %v742_v16, %v134_v25  ;;  %v152_v27 = vrot.slane %v991_v22, 7  ;;  %v173_v39 = vrot.slane %v991_v22, 1  ;;  %v319_v43 = vrot.slane %v991_v22, 6 }
  0xde   :  { %v994_v28 = vmax.f32 %v140_v24, 0.0  ;;  %v181_v42 = vsel %vm172_vm2, %v174_v40, 0.0  ;;  %v352_v49 = vrot.slane %v991_v22, 2  ;;  %v353_v50 = vrot.slane %v989_v21, 2 }
  0xdf   :  { %v997_v30 = vmax.f32 %v135_v26, 0.0  ;;  %339 = vrot.lane.b32.xlu0 %v152_v27, %s876_s2  ;;  %v154_v34 = vsel %vm151_vm1, %v152_v27, %v153_v29  ;;  %v175_v41 = vsel %vm172_vm2, %v173_v39, %v174_v40  ;;  %v321_v45 = vsel %vm318_vm3, %v319_v43, %v320_v44 }
  0xe0   :  { %v156_v35 = vrot.slane %v994_v28, 7  ;;  %v177_v46 = vrot.slane %v994_v28, 1  ;;  %v354_v55 = vsel %vm351_vm4, %v352_v49, %v353_v50  ;;  %v323_v56 = vrot.slane %v994_v28, 6 }
  0xe1   :  { %v155_v33 = vrot.slane %v997_v30, 7  ;;  %v322_v47 = vrot.slane %v997_v30, 6  ;;  %v360_v57 = vsel %vm351_vm4, %v353_v50, 0.0  ;;  %v176_v59 = vrot.slane %v997_v30, 1 }
  0xe2   :  { %v182_v48 = vsel %vm172_vm2, %v177_v46, 0.0  ;;  %v537_v16 = vrot.slane %v960_v7, 1  ;;  %v355_v6 = vrot.slane %v997_v30, 2  ;;  %v356_v26 = vrot.slane %v994_v28, 2 }
  0xe3   :  { %343 = vrot.lane.b32.xlu1 %v155_v33, %s876_s2  ;;  %341 = vrot.lane.b32.xlu0 %v154_v34, %s876_s2  ;;  %v157_v38 = vsel %vm151_vm1, %v155_v33, %v156_v35  ;;  %v324_v58 = vsel %vm318_vm3, %v322_v47, %v323_v56  ;;  %v178_v60 = vsel %vm172_vm2, %v176_v59, %v177_v46 }
  0xe4   :  { %v538_v18 = vsel %vm172_vm2, %v536_v12, %v537_v16  ;;  %v544_v19 = vsel %vm172_vm2, %v537_v16, -inf  ;;  %v357_v7 = vsel %vm351_vm4, %v355_v6, %v356_v26  ;;  %v361_v32 = vsel %vm351_vm4, %v356_v26, 0.0 }
  0xe5   :  { %v551_v20 = vmax.f32 %v547_v2, %v538_v18  ;;  %v552_v8 = vmax.f32 %v548_v14, %v544_v19  ;;  %v747_v18 = vld [vmem:[%s1200_s4] ss:$0 sm:$0xff]  ;;  %s880_s4 = smov 32  }
  0xe7   :  { %345 = vrot.lane.b32.xlu1 %v157_v38, %s876_s2  ;;  %158 = vrot.lane.b32.xlu0 %v152_v27, %s877_s25 }
  0xeb   :  { %160 = vrot.lane.b32.xlu1 %v154_v34, %s877_s25  ;;  %185 = vrot.lane.b32.xlu0 %v175_v41, %s878_s3 }
  0xef   :  { %187 = vrot.lane.b32.xlu1 %v181_v42, %s878_s3  ;;  %162 = vrot.lane.b32.xlu0 %v155_v33, %s877_s25 }
  0xf3   :  { %325 = vrot.lane.b32.xlu1 %v319_v43, %s876_s2  ;;  %327 = vrot.lane.b32.xlu0 %v321_v45, %s876_s2 }
  0xf7   :  { %191 = vrot.lane.b32.xlu1 %v182_v48, %s878_s3  ;;  %329 = vrot.lane.b32.xlu0 %v322_v47, %s876_s2 }
  0xfb   :  { %378 = vrot.lane.b32.xlu1 %v354_v55, %s879_s11  ;;  %164 = vrot.lane.b32.xlu0 %v157_v38, %s877_s25 }
  0xff   :  { %380 = vrot.lane.b32.xlu1 %v360_v57, %s879_s11  ;;  %331 = vrot.lane.b32.xlu0 %v324_v58, %s876_s2  ;;  %s881_s2 = smov 24  }
 0x103   :  { %189 = vrot.lane.b32.xlu1 %v178_v60, %s878_s3 }
 0x151   :  { %v340_v5 = vpop.permute.xlu0 %339 }
 0x152   :  { %v349_v17 = vsel %vm151_vm1, 0.0, %v340_v5 }
 0x153   :  { %364 = vrot.lane.b32.xlu0 %v349_v17, %s878_s3 }
 0x155   :  { %v344_v23 = vpop.permute.xlu1 %343  ;;  %v342_v24 = vpop.permute.xlu0 %341 }
 0x156   :  { %v350_v25 = vsel %vm151_vm1, 0.0, %v344_v23  ;;  %366 = vrot.lane.b32.xlu1 %v342_v24, %s878_s3 }
 0x157   :  { %368 = vrot.lane.b32.xlu0 %v350_v25, %s878_s3 }
 0x159   :  { %v346_v27 = vpop.permute.xlu1 %345  ;;  %v159_v29 = vpop.permute.xlu0 %158 }
 0x15a   :  { %v170_v31 = vsel %vm151_vm1, 0.0, %v159_v29  ;;  %370 = vrot.lane.b32.xlu1 %v346_v27, %s878_s3 }
 0x15b   :  { %382 = vrot.lane.b32.xlu0 %v357_v7, %s879_s11  ;;  %v197_v33 = vsel %vm45_vm0, %v170_v31, %v991_v22  ;;  %v757_v31 = vld [vmem:[%s1204_s8] ss:$0 sm:$0xff] }
 0x15d   :  { %v161_v13 = vpop.permute.xlu1 %160  ;;  %v186_v14 = vpop.permute.xlu0 %185 }
 0x15e   :  { %384 = vrot.lane.b32.xlu1 %v361_v32, %s879_s11  ;;  %v202_v34 = vsel %vm201_vm5, %v197_v33, %v186_v14  ;;  %v198_v35 = vsel %vm45_vm0, %v161_v13, %v989_v21 }
 0x15f   :  { %802 = vmatprep.mubr.msk.f32.mxu1 %vm216_vm6, %v202_v34 }
 0x161   :  { %v188_v36 = vpop.permute.xlu1 %187  ;;  %v163_v37 = vpop.permute.xlu0 %162 }
 0x162   :  { %v203_v38 = vsel %vm201_vm5, %v198_v35, %v188_v36  ;;  %v171_v46 = vsel %vm151_vm1, 0.0, %v163_v37 }
 0x163   :  { %803 = vmatmul.mubr.msk.f32.vlgmr.msra.gmra.mrb[0].mxu1 %vm216_vm6, %v203_v38  ;;  %v199_v48 = vsel %vm45_vm0, %v171_v46, %v997_v30 }
 0x164   :  { %825 = vmatpush3.msra.mxu1 %v1040_v51 }
 0x165   :  { %v326_v39 = vpop.permute.xlu1 %325  ;;  %v328_v40 = vpop.permute.xlu0 %327 }
 0x166   :  { %v337_v53 = vsel %vm318_vm3, 0.0, %v326_v39 }
 0x169   :  { %v192_v41 = vpop.permute.xlu1 %191  ;;  %v330_v42 = vpop.permute.xlu0 %329 }
 0x16d   :  { %v379_v43 = vpop.permute.xlu1 %378  ;;  %v165_v44 = vpop.permute.xlu0 %164 }
 0x16e   :  { %v200_v47 = vsel %vm45_vm0, %v165_v44, %v994_v28 }
 0x16f   :  { %v205_v51 = vsel %vm201_vm5, %v200_v47, %v192_v41 }
 0x171   :  { %v381_v45 = vpop.permute.xlu1 %380  ;;  %v332_v52 = vpop.permute.xlu0 %331 }
 0x175   :  { %v190_v49 = vpop.permute.xlu1 %189 }
 0x176   :  { %v204_v50 = vsel %vm201_vm5, %v199_v48, %v190_v49 }
 0x177   :  { %805 = vmatprep.mubr.msk.f32.mxu1 %vm216_vm6, %v204_v50 }
 0x178   :  { %806 = vmatmul.mubr.msk.f32.gmra.mrb[2].mxu1 %vm216_vm6, %v205_v51 }
 0x179   :  { %826 = vmatprep.mubr.msk.f32.mxu1 %vm45_vm0, %v549_v11 }
 0x17c   :  { %827 = vmatmul.mubr.msk.f32.vlgmr.msra.gmra.mrb[4].mxu1 %vm45_vm0, %v982_v15  ;;  %v338_v15 = vsel %vm318_vm3, 0.0, %v330_v42 }
 0x17d   :  { %829 = vmatprep.mubr.msk.f32.mxu1 %vm45_vm0, %v551_v20 }
 0x180   :  { %830 = vmatmul.mubr.msk.f32.gmra.mrb[6].mxu1 %vm45_vm0, %v552_v8 }
 0x1c5   :  { %v365_v54 = vpop.permute.xlu0 %364 }
 0x1c6   :  { %v390_v55 = vsel %vm45_vm0, %v337_v53, %v365_v54 }
 0x1c7   :  { %v394_v56 = vsel %vm201_vm5, %v390_v55, %v991_v22 }
 0x1c8   :  { %v367_v57 = vpop.permute.xlu1 %366  ;;  %v398_v58 = vsel %vm216_vm6, %v394_v56, %v186_v14 }
 0x1c9   :  { %v391_v59 = vsel %vm45_vm0, %v328_v40, %v367_v57  ;;  %v369_v60 = vpop.permute.xlu0 %368  ;;  %v403_v61 = vsel %vm402_vm7, %v398_v58, %v379_v43 }
 0x1ca   :  { %v395_v62 = vsel %vm201_vm5, %v391_v59, %v989_v21  ;;  %v392_v63 = vsel %vm45_vm0, %v338_v15, %v369_v60  ;;  %818 = vmatprep.mubr.msk.f32.mxu0 %vm419_vm8, %v403_v61 }
 0x1cb   :  { %v399_v0 = vsel %vm216_vm6, %v395_v62, %v188_v36  ;;  %v396_v4 = vsel %vm201_vm5, %v392_v63, %v997_v30 }
 0x1cc   :  { %v371_v9 = vpop.permute.xlu1 %370  ;;  %v404_v10 = vsel %vm402_vm7, %v399_v0, %v381_v45  ;;  %v400_v11 = vsel %vm216_vm6, %v396_v4, %v190_v49 }
 0x1cd   :  { %v393_v1 = vsel %vm45_vm0, %v332_v52, %v371_v9  ;;  %819 = vmatmul.mubr.msk.f32.vlgmr.msra.gmra.mrb[4].mxu0 %vm419_vm8, %v404_v10  ;;  %v383_v3 = vpop.permute.xlu0 %382 }
 0x1ce   :  { %v397_v12 = vsel %vm201_vm5, %v393_v1, %v994_v28  ;;  %v405_v16 = vsel %vm402_vm7, %v400_v11, %v383_v3 }
 0x1cf   :  { %821 = vmatprep.mubr.msk.f32.mxu0 %vm419_vm8, %v405_v16  ;;  %v401_v2 = vsel %vm216_vm6, %v397_v12, %v192_v41  ;;  %v752_v41 = vld [vmem:[%s1202_s6] ss:$0 sm:$0xff]  ;;  %s882_s6 = smov [#allocation2]  }
 0x1d0   :  { %v385_v5 = vpop.permute.xlu1 %384  ;;  %s731_s19 = sshll.u32 %s882_s6, 4  ;;  %s732_s19 = int_to_ptr.vmem [resolvable:$true] %s731_s19 }
 0x1d1   :  { %v406_v17 = vsel %vm402_vm7, %v401_v2, %v385_v5  ;;  %s852_s20 = scalar_lea.vmem %s732_s19, 512  ;;  %p857_p1 = scmp.lt.s32.totalorder %s732_s19, %s732_s19 }
 0x1d2   :  { %822 = vmatmul.mubr.msk.f32.gmra.mrb[6].mxu0 %vm419_vm8, %v406_v17  ;;  %p853_p0 = scmp.ne.s32.totalorder %s732_s19, %s852_s20  ;;  %p858_p2 = scmp.lt.s32.totalorder %s852_s20, %s852_s20 }
 0x1d4   :  { %p859_p3 = por %p858_p2, %p857_p1 }
 0x1d6   :  { %p860_p4 = pnand %p859_p3, %p853_p0 }
 0x236   :  { %v804_v19 = vpop.f32.mrb[0].mxu1 }
 0x237   :  { %v301_v20 = vadd.f32 %v804_v19, %v747_v18  ;;  %v295_v8 = vpop.f32.mrb[1].mxu1 }
 0x238   :  { %v296_v23 = vadd.f32 %v747_v18, %v295_v8 }
 0x239   :  { %v315_v24 = vmax.f32 %v301_v20, 0.0 }
 0x23a   :  { %v314_v25 = vmax.f32 %v296_v23, 0.0 }
 0x23b   :  { %668 = vrot.lane.b32.xlu1 %v315_v24, %s878_s3 }
 0x23c   :  { %666 = vrot.lane.b32.xlu0 %v314_v25, %s878_s3 }
 0x24b   :  { %v807_v6 = vpop.f32.mrb[2].mxu1 }
 0x24c   :  { %v311_v26 = vadd.f32 %v807_v6, %v747_v18  ;;  %v305_v27 = vpop.f32.mrb[3].mxu1 }
 0x24d   :  { %v306_v29 = vadd.f32 %v747_v18, %v305_v27 }
 0x24e   :  { %v317_v7 = vmax.f32 %v311_v26, 0.0 }
 0x24f   :  { %v316_v13 = vmax.f32 %v306_v29, 0.0  ;;  %v828_v14 = vpop.f32.mrb[4].mxu1 }
 0x250   :  { %672 = vrot.lane.b32.xlu1 %v317_v7, %s878_s3  ;;  %v645_v32 = vadd.f32 %v828_v14, %v757_v31  ;;  %v639_v33 = vpop.f32.mrb[5].mxu1 }
 0x251   :  { %670 = vrot.lane.b32.xlu0 %v316_v13, %s878_s3  ;;  %v640_v34 = vadd.f32 %v757_v31, %v639_v33 }
 0x252   :  { %v659_v35 = vmax.f32 %v645_v32, 0.0 }
 0x253   :  { %v658_v36 = vmax.f32 %v640_v34, 0.0  ;;  %v831_v37 = vpop.f32.mrb[6].mxu1 }
 0x254   :  { %700 = vrot.lane.b32.xlu1 %v659_v35, %s880_s4  ;;  %v655_v38 = vadd.f32 %v831_v37, %v757_v31  ;;  %v649_v39 = vpop.f32.mrb[7].mxu1 }
 0x255   :  { %698 = vrot.lane.b32.xlu0 %v658_v36, %s880_s4  ;;  %v650_v40 = vadd.f32 %v757_v31, %v649_v39 }
 0x256   :  { %v661_v54 = vmax.f32 %v655_v38, 0.0 }
 0x257   :  { %v660_v55 = vmax.f32 %v650_v40, 0.0 }
 0x2a0   :  { %v820_v42 = vpop.f32.mrb[4].mxu0 }
 0x2a1   :  { %v504_v43 = vadd.f32 %v820_v42, %v752_v41  ;;  %v498_v44 = vpop.f32.mrb[5].mxu0 }
 0x2a2   :  { %v499_v45 = vadd.f32 %v752_v41, %v498_v44 }
 0x2a3   :  { %v518_v46 = vmax.f32 %v504_v43, 0.0 }
 0x2a4   :  { %v517_v47 = vmax.f32 %v499_v45, 0.0 }
 0x2a5   :  { %684 = vrot.lane.b32.xlu1 %v518_v46, %s881_s2  ;;  %v823_v48 = vpop.f32.mrb[6].mxu0 }
 0x2a6   :  { %v514_v49 = vadd.f32 %v823_v48, %v752_v41  ;;  %682 = vrot.lane.b32.xlu0 %v517_v47, %s881_s2  ;;  %v508_v50 = vpop.f32.mrb[7].mxu0 }
 0x2a7   :  { %v509_v51 = vadd.f32 %v752_v41, %v508_v50 }
 0x2a8   :  { %v520_v52 = vmax.f32 %v514_v49, 0.0 }
 0x2a9   :  { %v519_v53 = vmax.f32 %v509_v51, 0.0 }
 0x2aa   :  { %688 = vrot.lane.b32.xlu1 %v520_v52, %s881_s2 }
 0x2ab   :  { %686 = vrot.lane.b32.xlu0 %v519_v53, %s881_s2 }
 0x2ad   :  { %v669_v56 = vpop.permute.xlu1 %668 }
 0x2ae   :  { %704 = vrot.lane.b32.xlu1 %v661_v54, %s880_s4  ;;  %v667_v57 = vpop.permute.xlu0 %666  ;;  %v711_v61 = vsel %vm45_vm0, %v989_v21, %v669_v56 }
 0x2af   :  { %702 = vrot.lane.b32.xlu0 %v660_v55, %s880_s4  ;;  %v710_v63 = vsel %vm45_vm0, %v991_v22, %v667_v57 }
 0x2c2   :  { %v673_v58 = vpop.permute.xlu1 %672 }
 0x2c3   :  { %v671_v15 = vpop.permute.xlu0 %670  ;;  %v713_v21 = vsel %vm45_vm0, %v994_v28, %v673_v58 }
 0x2c4   :  { %v712_v22 = vsel %vm45_vm0, %v997_v30, %v671_v15 }
 0x2c6   :  { %v701_v59 = vpop.permute.xlu1 %700 }
 0x2c7   :  { %v699_v60 = vpop.permute.xlu0 %698 }
 0x317   :  { %v685_v62 = vpop.permute.xlu1 %684 }
 0x318   :  { %v715_v0 = vsel %vm216_vm6, %v711_v61, %v685_v62  ;;  %v683_v4 = vpop.permute.xlu0 %682 }
 0x319   :  { %v719_v9 = vsel %vm402_vm7, %v715_v0, %v701_v59  ;;  %v714_v10 = vsel %vm216_vm6, %v710_v63, %v683_v4 }
 0x31a   :  { %723 = vst.msk [vmem:[#allocation2 + $0x8] sm:$0xff] %vm419_vm8, %v719_v9  ;;  %v718_v11 = vsel %vm402_vm7, %v714_v10, %v699_v60 }
 0x31b   :  { %722 = vst.msk [vmem:[#allocation2] sm:$0xff] %vm419_vm8, %v718_v11 }
 0x31c   :  { %v689_v1 = vpop.permute.xlu1 %688 }
 0x31d   :  { %v687_v3 = vpop.permute.xlu0 %686  ;;  %v717_v12 = vsel %vm216_vm6, %v713_v21, %v689_v1 }
 0x31e   :  { %v716_v2 = vsel %vm216_vm6, %v712_v22, %v687_v3 }
 0x320   :  { %v705_v16 = vpop.permute.xlu1 %704 }
 0x321   :  { %v721_v5 = vsel %vm402_vm7, %v717_v12, %v705_v16  ;;  %v703_v17 = vpop.permute.xlu0 %702 }
 0x322   :  { %725 = vst.msk [vmem:[#allocation2 + $0x18] sm:$0xff] %vm419_vm8, %v721_v5  ;;  %v720_v18 = vsel %vm402_vm7, %v716_v2, %v703_v17 }
 0x323   :  { %724 = vst.msk [vmem:[#allocation2 + $0x10] sm:$0xff] %vm419_vm8, %v720_v18 }
 0x324   :  { %863 = shalt.err (!%p860_p4)
}
 0x325   :  { %s864_s23 = scalar_lea.hbm %s1205_s9, 512 }
 0x326   :  { %p865_p5 = scmp.ne.s32.totalorder %s1205_s9, %s864_s23  ;;  %p868_p6 = scmp.lt.u32.totalorder %s864_s23, %s1205_s9 }
 0x328   :  { %p870_p7 = pnand %p868_p6, %p865_p5 }
 0x32a   :  { %873 = shalt.err (!%p870_p7)
}
 0x32b   :  { %s883_s28 = smov 128  }
 0x32c   :  { %737 = dma.vmem_to_hbm [thread:$0]  %s732_s19, 512, %s1205_s9, [#allocation3], %s883_s28, %s883_s28, %s878_s3  }
 0x32d   :  { %874 = dma.done.wait [#allocation3], 512  }
 0x32e   :  { %875 = vsyncadd [#allocation3], 4294966784 }
 0x32f   :  { %741 = vsyncpa [#allocation3], 1 }

</bundles_post_ra>
